<compile_context>
chip_gen: v6e
topology: v6e:2x2x1
jax: 0.10.0
libtpu: 0.0.40
codegen_flags: <defaults>
</compile_context>

<pallas_src>
import jax
import jax.numpy as jnp
from jax.experimental import pallas as pl
from jax.experimental.pallas import tpu as pltpu

_LANES = 128
_SUBLANES = 8
_NUM_CORES = 2      # leading "parallel" grid axis (v7x has 2 TensorCores/chip)
_TM_TARGET = 2048   # rows per input tile (~1 MiB f32) -> 85%+ of HBM roofline


def _loss_partials_kernel(out1_ref, tgt1_ref, out2_ref, part1_ref, part2_ref):
    i = pl.program_id(1)  # reduction step along the "arbitrary" axis

    @pl.when(i == 0)
    def _init():
        part1_ref[...] = jnp.zeros_like(part1_ref)
        part2_ref[...] = jnp.zeros_like(part2_ref)

    # Upcast in-kernel (inputs may be streamed as bf16); both sums are fused
    # into a single pass over the streamed tiles.
    d = out1_ref[...].astype(jnp.float32) - tgt1_ref[...].astype(jnp.float32)
    o2 = out2_ref[...].astype(jnp.float32)

    # Fold (TM, 128) -> (1, TM//8, 8, 128) (layout-preserving) and reduce the
    # folded axis: pure vreg-wise adds on the VPU.  The expensive cross-lane
    # reduce is deferred to a single tiny op in the wrapper.
    part1_ref[...] += (d * d).reshape(1, -1, _SUBLANES, _LANES).sum(axis=1)
    part2_ref[...] += (o2 * o2).reshape(1, -1, _SUBLANES, _LANES).sum(axis=1)


def _cdiv(a, b):
    return -(-a // b)


def _tiling(max_elems):
    """Pick (rows_padded, tile_rows, blocks_per_core) for the slab layout."""
    rows = max(_cdiv(max_elems, _LANES), _SUBLANES)
    per_core = _cdiv(rows, _NUM_CORES)
    per_core = _cdiv(per_core, _SUBLANES) * _SUBLANES      # multiple of 8
    tile_rows = min(_TM_TARGET, per_core)                  # multiple of 8
    blocks_per_core = _cdiv(per_core, tile_rows)
    per_core = blocks_per_core * tile_rows
    rows_padded = _NUM_CORES * per_core
    return rows_padded, tile_rows, blocks_per_core


def _to_slab(x, rows_padded):
    """Flatten to a lane-dense [rows_padded, 128] slab, zero-padded."""
    flat = jnp.ravel(x)
    pad = rows_padded * _LANES - flat.size
    if pad:
        flat = jnp.pad(flat, (0, pad))
    return flat.reshape(rows_padded, _LANES)


def simple_multi_arg_loss(model_outputs, labels):
    """Mirrors SimpleMultiArgLoss.forward; returns a scalar float32 loss."""
    out1, out2 = model_outputs
    target1 = labels[0]
    assert out1.shape == target1.shape

    n1 = out1.size
    n2 = out2.size
    rows_padded, tm, nb = _tiling(max(n1, n2))

    a = _to_slab(out1, rows_padded)
    b = _to_slab(target1, rows_padded)
    c = _to_slab(out2, rows_padded)

    # Core `cidx` owns row blocks [cidx*nb, (cidx+1)*nb); block i is its i-th.
    in_spec = pl.BlockSpec((tm, _LANES), lambda cidx, i: (cidx * nb + i, 0))
    # Per-core accumulator block: index independent of i -> resident across
    # the reduction axis (accumulator pattern), lane-dense (8, 128) layout.
    part_spec = pl.BlockSpec((1, _SUBLANES, _LANES), lambda cidx, i: (cidx, 0, 0))
    part_shape = jax.ShapeDtypeStruct((_NUM_CORES, _SUBLANES, _LANES), jnp.float32)

    part1, part2 = pl.pallas_call(
        _loss_partials_kernel,
        grid=(_NUM_CORES, nb),
        in_specs=[in_spec, in_spec, in_spec],
        out_specs=(part_spec, part_spec),
        out_shape=(part_shape, part_shape),
        compiler_params=pltpu.CompilerParams(
            dimension_semantics=("parallel", "arbitrary")),
    )(a, b, c)

    # One tiny cross-lane reduction over the (2, 8, 128) partials; the zero
    # padding contributed nothing, so dividing by the true counts gives the
    # exact means.
    return jnp.sum(part1) / jnp.float32(n1) + jnp.sum(part2) / jnp.float32(n2)


if __name__ == "__main__":
    key = jax.random.PRNGKey(0)
    k1, k2, k3 = jax.random.split(key, 3)

    # Small NCHW-style shapes: batch=2, channels=4, spatial=16x16.
    out1 = jax.random.normal(k1, (2, 4, 16, 16), dtype=jnp.float32)
    out2 = jax.random.normal(k2, (2, 4, 16, 16), dtype=jnp.float32)
    target1 = jax.random.normal(k3, (2, 4, 16, 16), dtype=jnp.float32)

    loss = simple_multi_arg_loss((out1, out2), (target1,))
    loss = jax.block_until_ready(loss)

    # Reference check in plain JAX.
    ref = jnp.mean((out1 - target1) ** 2) + jnp.mean(out2 ** 2)
    assert jnp.allclose(loss, ref, rtol=1e-5, atol=1e-6), (loss, ref)

    print("KERNEL_OK")
</pallas_src>

<mosaic_0001>
module attributes {stable_mosaic.version = 11 : i64} {
  func.func @_loss_partials_kernel(%arg0: i32, %arg1: i32, %arg2: memref<8x128xf32, #tpu.memory_space<vmem>>, %arg3: memref<8x128xf32, #tpu.memory_space<vmem>>, %arg4: memref<8x128xf32, #tpu.memory_space<vmem>>, %arg5: memref<1x8x128xf32, #tpu.memory_space<vmem>>, %arg6: memref<1x8x128xf32, #tpu.memory_space<vmem>>) attributes {dimension_semantics = [#tpu.dimension_semantics<parallel>, #tpu.dimension_semantics<arbitrary>], iteration_bounds = array<i64: 2, 1>, scalar_prefetch = 0 : i64, scratch_operands = 0 : i64, tpu.core_type = #tpu.core_type<tc>, window_params = [{transform_indices = @transform_0, window_bounds = array<i64: 8, 128>}, {transform_indices = @transform_1, window_bounds = array<i64: 8, 128>}, {transform_indices = @transform_2, window_bounds = array<i64: 8, 128>}, {transform_indices = @transform_3, window_bounds = array<i64: 1, 8, 128>}, {transform_indices = @transform_4, window_bounds = array<i64: 1, 8, 128>}]} {
    %c0_i32 = arith.constant 0 : i32
    %0 = arith.cmpi eq, %arg1, %c0_i32 : i32
    %1 = arith.extui %0 : i1 to i32
    %c0_i32_0 = arith.constant 0 : i32
    %2 = arith.cmpi ne, %1, %c0_i32_0 : i32
    scf.if %2 {
      %cst_19 = arith.constant 0.000000e+00 : f32
      %19 = vector.broadcast %cst_19 : f32 to vector<1x8x128xf32>
      %c0_20 = arith.constant 0 : index
      %c0_21 = arith.constant 0 : index
      %c0_22 = arith.constant 0 : index
      %20 = vector.load %arg5[%c0_20, %c0_21, %c0_22] : memref<1x8x128xf32, #tpu.memory_space<vmem>>, vector<1x8x128xf32>
      tpu.vector_store %arg5[%c0_20, %c0_21, %c0_22], %19 {strides = array<i32>} : memref<1x8x128xf32, #tpu.memory_space<vmem>>, vector<1x8x128xf32>,
      %cst_23 = arith.constant 0.000000e+00 : f32
      %21 = vector.broadcast %cst_23 : f32 to vector<1x8x128xf32>
      %c0_24 = arith.constant 0 : index
      %c0_25 = arith.constant 0 : index
      %c0_26 = arith.constant 0 : index
      %22 = vector.load %arg6[%c0_24, %c0_25, %c0_26] : memref<1x8x128xf32, #tpu.memory_space<vmem>>, vector<1x8x128xf32>
      tpu.vector_store %arg6[%c0_24, %c0_25, %c0_26], %21 {strides = array<i32>} : memref<1x8x128xf32, #tpu.memory_space<vmem>>, vector<1x8x128xf32>,
    } else {
    }
    %c0 = arith.constant 0 : index
    %c0_1 = arith.constant 0 : index
    %3 = vector.load %arg2[%c0, %c0_1] : memref<8x128xf32, #tpu.memory_space<vmem>>, vector<8x128xf32>
    %c0_2 = arith.constant 0 : index
    %c0_3 = arith.constant 0 : index
    %4 = vector.load %arg3[%c0_2, %c0_3] : memref<8x128xf32, #tpu.memory_space<vmem>>, vector<8x128xf32>
    %5 = arith.subf %3, %4 : vector<8x128xf32>
    %c0_4 = arith.constant 0 : index
    %c0_5 = arith.constant 0 : index
    %6 = vector.load %arg4[%c0_4, %c0_5] : memref<8x128xf32, #tpu.memory_space<vmem>>, vector<8x128xf32>
    %c0_6 = arith.constant 0 : index
    %c0_7 = arith.constant 0 : index
    %c0_8 = arith.constant 0 : index
    %7 = vector.load %arg5[%c0_6, %c0_7, %c0_8] : memref<1x8x128xf32, #tpu.memory_space<vmem>>, vector<1x8x128xf32>
    %8 = arith.mulf %5, %5 : vector<8x128xf32>
    %9 = vector.shape_cast %8 : vector<8x128xf32> to vector<1x1x8x128xf32>
    %cst = arith.constant dense<0.000000e+00> : vector<1x8x128xf32>
    %10 = vector.multi_reduction <add>, %9, %cst [1] : vector<1x1x8x128xf32> to vector<1x8x128xf32>
    %11 = arith.addf %7, %10 : vector<1x8x128xf32>
    %c0_9 = arith.constant 0 : index
    %c0_10 = arith.constant 0 : index
    %c0_11 = arith.constant 0 : index
    %12 = vector.load %arg5[%c0_9, %c0_10, %c0_11] : memref<1x8x128xf32, #tpu.memory_space<vmem>>, vector<1x8x128xf32>
    tpu.vector_store %arg5[%c0_9, %c0_10, %c0_11], %11 {strides = array<i32>} : memref<1x8x128xf32, #tpu.memory_space<vmem>>, vector<1x8x128xf32>,
    %c0_12 = arith.constant 0 : index
    %c0_13 = arith.constant 0 : index
    %c0_14 = arith.constant 0 : index
    %13 = vector.load %arg6[%c0_12, %c0_13, %c0_14] : memref<1x8x128xf32, #tpu.memory_space<vmem>>, vector<1x8x128xf32>
    %14 = arith.mulf %6, %6 : vector<8x128xf32>
    %15 = vector.shape_cast %14 : vector<8x128xf32> to vector<1x1x8x128xf32>
    %cst_15 = arith.constant dense<0.000000e+00> : vector<1x8x128xf32>
    %16 = vector.multi_reduction <add>, %15, %cst_15 [1] : vector<1x1x8x128xf32> to vector<1x8x128xf32>
    %17 = arith.addf %13, %16 : vector<1x8x128xf32>
    %c0_16 = arith.constant 0 : index
    %c0_17 = arith.constant 0 : index
    %c0_18 = arith.constant 0 : index
    %18 = vector.load %arg6[%c0_16, %c0_17, %c0_18] : memref<1x8x128xf32, #tpu.memory_space<vmem>>, vector<1x8x128xf32>
    tpu.vector_store %arg6[%c0_16, %c0_17, %c0_18], %17 {strides = array<i32>} : memref<1x8x128xf32, #tpu.memory_space<vmem>>, vector<1x8x128xf32>,
    return
  }
  func.func @transform_0(%arg0: i32, %arg1: i32) -> (i32, i32) {
    %c1_i32 = arith.constant 1 : i32
    %0 = arith.muli %arg0, %c1_i32 : i32
    %1 = arith.addi %0, %arg1 : i32
    %c0_i32 = arith.constant 0 : i32
    %c0_i32_0 = arith.constant 0 : i32
    return %1, %c0_i32 : i32, i32
  }
  func.func @transform_1(%arg0: i32, %arg1: i32) -> (i32, i32) {
    %c1_i32 = arith.constant 1 : i32
    %0 = arith.muli %arg0, %c1_i32 : i32
    %1 = arith.addi %0, %arg1 : i32
    %c0_i32 = arith.constant 0 : i32
    %c0_i32_0 = arith.constant 0 : i32
    return %1, %c0_i32 : i32, i32
  }
  func.func @transform_2(%arg0: i32, %arg1: i32) -> (i32, i32) {
    %c1_i32 = arith.constant 1 : i32
    %0 = arith.muli %arg0, %c1_i32 : i32
    %1 = arith.addi %0, %arg1 : i32
    %c0_i32 = arith.constant 0 : i32
    %c0_i32_0 = arith.constant 0 : i32
    return %1, %c0_i32 : i32, i32
  }
  func.func @transform_3(%arg0: i32, %arg1: i32) -> (i32, i32, i32) {
    %c0_i32 = arith.constant 0 : i32
    %c0_i32_0 = arith.constant 0 : i32
    %c0_i32_1 = arith.constant 0 : i32
    return %arg0, %c0_i32, %c0_i32_0 : i32, i32, i32
  }
  func.func @transform_4(%arg0: i32, %arg1: i32) -> (i32, i32, i32) {
    %c0_i32 = arith.constant 0 : i32
    %c0_i32_0 = arith.constant 0 : i32
    %c0_i32_1 = arith.constant 0 : i32
    return %arg0, %c0_i32, %c0_i32_0 : i32, i32, i32
  }
}

</mosaic_0001>

<bundles_post_ra>
// kernel: tpu_custom_call.1
= control target key start
LH: loop header
LB: loop body
LE: loop exit
PB: predicated region body
PF: predicated region fallthrough
CT: control target
= control target key end

     0   :  { %s1100_s0 = inlined_call_operand.hbm [shape: f32[16,128], index: 0, kind: input, shape index: {}]   ;;  %s1101_s1 = inlined_call_operand.hbm [shape: f32[16,128], index: 1, kind: input, shape index: {}]   ;;  %s1102_s2 = inlined_call_operand.hbm [shape: f32[16,128], index: 2, kind: input, shape index: {}]   ;;  %s1103_s3 = inlined_call_operand.hbm [shape: f32[2,8,128], index: 3, kind: output, shape index: {0}]   ;;  %s1104_s4 = inlined_call_operand.hbm [shape: f32[2,8,128], index: 4, kind: output, shape index: {1}]  }
   0x1   :  { %1108 = sst [smem:[#allocation18_spill]] %s1101_s1 }
   0x2   :  { %10 = vsyncpa [#allocation3], 0 }
   0x3   :  { %12 = vsyncpa [#allocation3 + $0x1], 0 }
   0x4   :  { %13 = vsyncpa [#allocation6], 0 }
   0x5   :  { %15 = vsyncpa [#allocation6 + $0x1], 0 }
   0x6   :  { %16 = vsyncpa [#allocation4], 0 }
   0x7   :  { %18 = vsyncpa [#allocation4 + $0x1], 0 }
   0x8   :  { %19 = vsyncpa [#allocation10], 0 }
   0x9   :  { %21 = vsyncpa [#allocation10 + $0x1], 0  ;;  %s857_s15 = smov 0   ;;  %s859_s16 = smov 0  }
   0xa   :  { %s861_s17 = smov 0   ;;  %s863_s18 = smov 0  }
   0xb   :  { %s865_s19 = smov 0   ;;  %s867_s20 = smov 0  }
   0xc LB: > { %1109 = sst [smem:[#allocation15_spill]] %s821_s19  ;;  %s888_s21 = sadd.s32 4294967295, %s825_s20   ;;  %s825_s20 = sphi %s867_s20, %s27_s20   ;;  %s821_s19 = sphi %s865_s19, %s1123_s19   ;;  %s817_s18 = sphi %s863_s18, %s1122_s18   ;;  %s813_s17 = sphi %s861_s17, %s1126_s17   ;;  %s809_s16 = sphi %s859_s16, %s1125_s16   ;;  %s805_s15 = sphi %s857_s15, %s1124_s15  }
   0xd   : > { %s528_s22 = sadd.s32 4294967294, %s825_s20   ;;  %s39_s23 = sadd.s32 1, %s821_s19 }
   0xe   : > { %s48_s24 = sadd.s32 1, %s813_s17  ;;  %p41_p0 = scmp.ge.s32.totalorder %s39_s23, 2 }
   0xf   : > { %p55_p1 = scmp.ne.s32.totalorder %s813_s17, %s809_s16  ;;  %p56_p2 = scmp.eq.s32.totalorder %s825_s20, 0 }
  0x10   : > { %p61_p3 = scmp.ne.s32.totalorder %s809_s16, %s805_s15  ;;  %s1128_s23 = smov (%p41_p0, %s39_s23), 0 }
  0x11   : > { %1110 = sst [smem:[#allocation16_spill]] %s1128_s23  ;;  %p900_p4 = por %p56_p2, %p55_p1 }
  0x12   : > { %p62_p5 = scmp.eq.s32.totalorder %s888_s21, 0  ;;  %s45_s26 = ssub.s32 %s821_s19, %s1128_s23 }
  0x13   : > { %p141_p6 = scmp.eq.s32.totalorder %s888_s21, 1  ;;  %p46_p7 = scmp.eq.s32.totalorder %s45_s26, 0 }
  0x14   : > { %p908_p8 = por %p62_p5, %p61_p3  ;;  %p147_p10 = scmp.eq.s32.totalorder %s528_s22, 1 }
  0x15   : > { %p912_p9 = por %p141_p6, %p55_p1  ;;  %p576_p13 = scmp.lt.s32.totalorder %s825_s20, 2 }
  0x16   : > { %s917_s29 = scalar_select %p46_p7, %s813_s17, %s48_s24  }
  0x17   : > { %p919_p11 = por %p147_p10, %p61_p3  ;;  %s1105_s5 = sand.u32 1, %s813_s17  }
  0x18   : > { %1114 = sst [smem:[#allocation17_spill]] %s917_s29  ;;  %s928_s6 = sshll.u32 %s1105_s5, 3 }
  0x19   : > { %s931_s7 = sshll.u32 %s821_s19, 7  ;;  %p935_p0 = pnand %p576_p13, %p900_p4 }
  0x1a   : > { %s212_s9 = sand.u32 1, %s825_s20   ;;  %s1117_s1 = sld [smem:[#allocation18_spill]] }
  0x1b   : > { %s216_s13 = scalar_lea.vmem [#allocation5], %s928_s6  ;;  %p537_p1 = scmp.ge.s32.totalorder %s825_s20, 1 }
  0x1c   : > { %s224_s14 = sshll.u32 %s216_s13, 4  ;;  %p248_p2 = scmp.lt.s32.totalorder %s825_s20, 3  ;;  %s225_s14 = int_to_ptr.vmem [resolvable:$true] %s224_s14 }
  0x1d   : > { %s947_s22 = scalar_lea.sflag [#allocation6], %s212_s9  ;;  %p629_p3 = pneg %p935_p0 }
  0x1e   : > { %s640_s24 = scalar_lea.vmem %s225_s14, 128  ;;  %s827_s25 = smov [#allocation5]  }
  0x1f   : > { %p641_p4 = scmp.ne.s32.totalorder %s225_s14, %s640_s24  ;;  %s645_s26 = sshll.u32 %s827_s25, 4  ;;  %s646_s26 = int_to_ptr.vmem [resolvable:$false] %s645_s26 }
  0x20   : > { %s222_s12 = scalar_lea.hbm %s1117_s1, %s931_s7  ;;  %s647_s10 = scalar_lea.vmem %s646_s26, 256 }
  0x21   : > { %p643_p5 = pnand %p641_p4, %p629_p3  ;;  %p648_p7 = scmp.lt.s32.totalorder %s225_s14, %s646_s26 }
  0x22   : > { %p649_p10 = scmp.lt.s32.totalorder %s647_s10, %s640_s24 }
  0x23   : > { %p644_p6 = pneg %p643_p5 }
  0x24   : > { %p650_p13 = por %p649_p10, %p648_p7 }
  0x26   : > { %p651_p12 = pnand %p650_p13, %p644_p6 }
  0x28   : > { %654 = shalt.err (!%p651_p12)
}
  0x29   : > { %565 = dma.hbm_to_vmem [thread:$0]  (!%p935_p0), %s222_s12, 128, %s225_s14, %s947_s22  }
  0x2a   : > { %p961_p4 = pnand %p537_p1, %p248_p2  ;;  %s203_s24 = scalar_lea.hbm %s1100_s0, %s931_s7 }
  0x2b   : > { %s197_s25 = scalar_lea.vmem [#allocation2], %s928_s6  ;;  %s241_s1 = scalar_lea.hbm %s1102_s2, %s931_s7 }
  0x2c   : > { %s205_s26 = sshll.u32 %s197_s25, 4  ;;  %s1119_s23 = sand.u32 1, %s813_s17   ;;  %s206_s26 = int_to_ptr.vmem [resolvable:$true] %s205_s26 }
  0x2d   : > { %s194_s19 = scalar_lea.sflag [#allocation3], %s1119_s23  ;;  %s668_s12 = scalar_lea.vmem %s206_s26, 128 }
  0x2e   : > { %p669_p12 = scmp.ne.s32.totalorder %s206_s26, %s668_s12  ;;  %s828_s14 = smov [#allocation2]  }
  0x2f   : > { %s673_s29 = sshll.u32 %s828_s14, 4  ;;  %s674_s29 = int_to_ptr.vmem [resolvable:$false] %s673_s29 }
  0x30   : > { %p671_p1 = pnand %p669_p12, %p629_p3  ;;  %s675_s11 = scalar_lea.vmem %s674_s29, 256 }
  0x31   : > { %p676_p5 = scmp.lt.s32.totalorder %s206_s26, %s674_s29  ;;  %p677_p6 = scmp.lt.s32.totalorder %s675_s11, %s668_s12 }
  0x32   : > { %p672_p2 = pneg %p671_p1 }
  0x33   : > { %p678_p7 = por %p677_p6, %p676_p5 }
  0x35   : > { %p679_p10 = pnand %p678_p7, %p672_p2 }
  0x37   : > { %682 = shalt.err (!%p679_p10)
}
  0x38   : > { %562 = dma.hbm_to_vmem [thread:$0]  (!%p935_p0), %s203_s24, 128, %s206_s26, %s194_s19  }
  0x39   : > { %s235_s23 = scalar_lea.vmem [#allocation7], %s928_s6  ;;  %s829_s25 = smov [#allocation7]  }
  0x3a   : > { %s243_s5 = sshll.u32 %s235_s23, 4  ;;  %s701_s29 = sshll.u32 %s829_s25, 4  ;;  %s244_s5 = int_to_ptr.vmem [resolvable:$true] %s243_s5  ;;  %s702_s29 = int_to_ptr.vmem [resolvable:$false] %s701_s29 }
  0x3b   : > { %s696_s13 = scalar_lea.vmem %s244_s5, 128  ;;  %s703_s10 = scalar_lea.vmem %s702_s29, 256 }
  0x3c   : > { %p697_p13 = scmp.ne.s32.totalorder %s244_s5, %s696_s13  ;;  %p704_p2 = scmp.lt.s32.totalorder %s244_s5, %s702_s29 }
  0x3d   : > { %p705_p5 = scmp.lt.s32.totalorder %s703_s10, %s696_s13 }
  0x3e   : > { %p699_p12 = pnand %p697_p13, %p629_p3 }
  0x3f   : > { %p706_p6 = por %p705_p5, %p704_p2 }
  0x40   : > { %p700_p1 = pneg %p699_p12 }
  0x42   : > { %p707_p7 = pnand %p706_p6, %p700_p1 }
  0x44   : > { %710 = shalt.err (!%p707_p7)
}
  0x45   : > { %568 = dma.hbm_to_vmem [thread:$0]  (!%p935_p0), %s241_s1, 128, %s244_s5, %s947_s22  }
  0x46   : > { %252 = sbr.rel (%p961_p4) target bundleno = 127 (0x7f), region = 32  ;;  %s996_s24 = sand.u32 (!%p961_p4), 1, %s809_s16  }
  0x47   : > { %s999_s26 = sshll.u32 (!%p961_p4), %s996_s24, 3  ;;  %s255_s8 = scalar_lea.sflag (!%p961_p4), [#allocation3], %s996_s24 }
  0x48   : > { %s258_s12 = scalar_lea.vmem (!%p961_p4), [#allocation2], %s999_s26 }
  0x4b   : > { %788 = dma.done.wait (%p908_p8), %s255_s8, 128  }
  0x4c   : > { %790 = vsyncadd (%p908_p8), %s255_s8, 4294967168  ;;  %s263_s1 = sand.u32 1, %s888_s21   ;;  %s267_s22 = scalar_lea.vmem [#allocation5], %s999_s26 }
  0x4d   : > { %s264_s7 = scalar_lea.sflag [#allocation6], %s263_s1 }
  0x4e   : > { %792 = dma.done.wait (%p908_p8), %s264_s7, 256  }
  0x4f   : > { %794 = vsyncadd (%p908_p8), %s264_s7, 4294967040  ;;  %v325_v0 = vld [vmem:[%s258_s12] sm:$0xff]  ;;  %v326_v1 = vld [vmem:[%s267_s22] sm:$0xff]  ;;  %s276_s9 = scalar_lea.vmem [#allocation7], %s999_s26  ;;  %s545_s14 = sshll.u32 %s817_s18, 7 }
  0x50   : > { %v328_v2 = vld [vmem:[%s276_s9] sm:$0xff]  ;;  %s315_s21 = scalar_lea.vmem [#allocation9], %s999_s26  ;;  %v327_v3 = vsub.f32 %v325_v0, %v326_v1  ;;  %s308_s23 = scalar_lea.vmem [#allocation8], %s999_s26 }
  0x51   : > { %s371_s11 = sshll.u32 %s315_s21, 4  ;;  %v335_v4 = vmul.f32 %v328_v2, %v328_v2  ;;  %s358_s27 = sshll.u32 %s308_s23, 4  ;;  %s1024_s11 = int_to_ptr.vmem [resolvable:$true] %s371_s11  ;;  %s1031_s27 = int_to_ptr.vmem [resolvable:$true] %s358_s27 }
  0x52   : > { %v330_v5 = vmul.f32 %v327_v3, %v327_v3  ;;  %s1022_s25 = scalar_lea.hbm %s1104_s4, %s545_s14  ;;  %s1029_s10 = scalar_lea.hbm %s1103_s3, %s545_s14 }
  0x53   : > { %338 = vst [vmem:[%s315_s21] sm:$0xff] %v335_v4  ;;  %s345_s19 = scalar_lea.sflag [#allocation10], %s996_s24  ;;  %s711_s6 = scalar_lea.vmem %s1024_s11, 128 }
  0x54   : > { %p712_p8 = scmp.ne.s32.totalorder %s1024_s11, %s711_s6  ;;  %s830_s8 = smov [#allocation9]  }
  0x55   : > { %s715_s12 = sshll.u32 %s830_s8, 4  ;;  %s716_s12 = int_to_ptr.vmem [resolvable:$false] %s715_s12 }
  0x56   : > { %p713_p0 = pnand %p712_p8, %p912_p9  ;;  %s717_s1 = scalar_lea.vmem %s716_s12, 256 }
  0x57   : > { %p718_p4 = scmp.lt.s32.totalorder %s1024_s11, %s716_s12  ;;  %p719_p10 = scmp.lt.s32.totalorder %s717_s1, %s711_s6 }
  0x58   : > { %p714_p3 = pneg %p713_p0 }
  0x59   : > { %p720_p13 = por %p719_p10, %p718_p4 }
  0x5b   : > { %p721_p12 = pnand %p720_p13, %p714_p3 }
  0x5d   : > { %724 = shalt.err (!%p721_p12)
}
  0x5e   : > { %s725_s7 = scalar_lea.hbm %s1022_s25, 128  ;;  %s729_s14 = scalar_lea.hbm %s1104_s4, 256 }
  0x5f   : > { %p726_p1 = scmp.ne.s32.totalorder %s1022_s25, %s725_s7  ;;  %p730_p6 = scmp.lt.s32.totalorder %s1022_s25, %s1104_s4 }
  0x60   : > { %p731_p7 = scmp.lt.s32.totalorder %s729_s14, %s725_s7 }
  0x61   : > { %p727_p2 = pnand %p726_p1, %p912_p9 }
  0x62   : > { %p732_p8 = por %p731_p7, %p730_p6 }
  0x63   : > { %p728_p5 = pneg %p727_p2 }
  0x65   : > { %p733_p0 = pnand %p732_p8, %p728_p5 }
  0x67   : > { %736 = shalt.err (!%p733_p0)
}
  0x68   : > { %556 = dma.vmem_to_hbm [thread:$0]  (%p912_p9), %s1024_s11, 128, %s1022_s25, %s345_s19   ;;  %333 = vst [vmem:[%s308_s23] sm:$0xff] %v330_v5 }
  0x69   : > { %s340_s13 = scalar_lea.sflag [#allocation4], %s996_s24  ;;  %s737_s18 = scalar_lea.vmem %s1031_s27, 128 }
  0x6a   : > { %p738_p3 = scmp.ne.s32.totalorder %s1031_s27, %s737_s18  ;;  %s831_s29 = smov [#allocation8]  }
  0x6b   : > { %s741_s6 = sshll.u32 %s831_s29, 4  ;;  %s742_s6 = int_to_ptr.vmem [resolvable:$false] %s741_s6 }
  0x6c   : > { %p739_p4 = pnand %p738_p3, %p912_p9  ;;  %s743_s8 = scalar_lea.vmem %s742_s6, 256 }
  0x6d   : > { %p744_p13 = scmp.lt.s32.totalorder %s1031_s27, %s742_s6  ;;  %p745_p12 = scmp.lt.s32.totalorder %s743_s8, %s737_s18 }
  0x6e   : > { %p740_p10 = pneg %p739_p4 }
  0x6f   : > { %p746_p1 = por %p745_p12, %p744_p13 }
  0x71   : > { %p747_p2 = pnand %p746_p1, %p740_p10 }
  0x73   : > { %750 = shalt.err (!%p747_p2)
}
  0x74   : > { %s751_s26 = scalar_lea.hbm %s1029_s10, 128  ;;  %s755_s23 = scalar_lea.hbm %s1103_s3, 256 }
  0x75   : > { %p752_p5 = scmp.ne.s32.totalorder %s1029_s10, %s751_s26  ;;  %p756_p8 = scmp.lt.s32.totalorder %s1029_s10, %s1103_s3 }
  0x76   : > { %p757_p0 = scmp.lt.s32.totalorder %s755_s23, %s751_s26 }
  0x77   : > { %p753_p6 = pnand %p752_p5, %p912_p9 }
  0x78   : > { %p758_p3 = por %p757_p0, %p756_p8 }
  0x79   : > { %p754_p7 = pneg %p753_p6 }
  0x7b   : > { %p759_p4 = pnand %p758_p3, %p754_p7 }
  0x7d   : > { %762 = shalt.err (!%p759_p4)
}
  0x7e   : > { %555 = dma.vmem_to_hbm [thread:$0]  (%p912_p9), %s1031_s27, 128, %s1029_s10, %s340_s13  }
  0x7f PF: > { %s383_s12 = sand.u32 1, %s805_s15   ;;  %p1120_p10 = scmp.ge.s32.totalorder %s825_s20, 2 }
  0x80   : > { %s384_s1 = scalar_lea.sflag [#allocation4], %s383_s12 }
  0x81   : > { %p570_p13 = pnand %p1120_p10, %p919_p11 }
  0x83   : > { %p571_p12 = pneg %p570_p13 }
  0x85   : > { %796 = dma.done.wait (%p571_p12), %s384_s1, 128  }
  0x86   : > { %798 = vsyncadd (%p571_p12), %s384_s1, 4294967168  ;;  %s393_s7 = scalar_lea.sflag [#allocation10], %s383_s12 }
  0x87   : > { %800 = dma.done.wait (%p571_p12), %s393_s7, 128  }
  0x88   : > { %802 = vsyncadd (%p571_p12), %s393_s7, 4294967168  ;;  %s27_s20 = sadd.s32 1, %s825_s20   ;;  %s1121_s28 = sld [smem:[#allocation17_spill]] }
  0x89   : > { %p24_p1 = scmp.ge.s32.totalorder %s27_s20, 4   ;;  %s1122_s18 = sld [smem:[#allocation15_spill]] }
  0x8a   : > { %s1123_s19 = sld [smem:[#allocation16_spill]]  ;;  %s1124_s15 = smov %s809_s16 }
  0x8b   : > { %s1125_s16 = smov %s813_s17  ;;  %26 = sbr.rel (!%p24_p1) target bundleno = 12 (0xc), region = 122 }
  0x8e   : > { %s1126_s17 = smov %s1121_s28 }
  0x90   :  { %398 = vsyncpa [#allocation3], 1 }
  0x91   :  { %400 = vsyncpa [#allocation3 + $0x1], 1 }
  0x92   :  { %401 = vsyncpa [#allocation6], 1 }
  0x93   :  { %403 = vsyncpa [#allocation6 + $0x1], 1 }
  0x94   :  { %404 = vsyncpa [#allocation4], 1 }
  0x95   :  { %406 = vsyncpa [#allocation4 + $0x1], 1 }
  0x96   :  { %407 = vsyncpa [#allocation10], 1 }
  0x97   :  { %409 = vsyncpa [#allocation10 + $0x1], 1 }

</bundles_post_ra>
